<compile_context>
chip_gen: v7x
topology: tpu7x:2x2x1
jax: 0.10.0
libtpu: 0.0.40
codegen_flags: <defaults>
</compile_context>

<pallas_src>
import jax
import jax.numpy as jnp
from jax import lax
from jax.experimental import pallas as pl
from jax.experimental.pallas import tpu as pltpu

_LANES = 128
_S_CHUNK_MAX = 512          # multiple of 128; sequences longer than this are chunked


def _round_up(x, m):
    return ((x + m - 1) // m) * m


def _slalom_kernel(ids_ref, mask_ref, tab_ref, out_ref, m_sc, l_sc, num_sc):
    """One (batch-tile, seq-chunk) step.

    ids/mask: [Bt, Sc] int32, tab: [K, 256] f32, out: [Bt, 1] f32,
    scratch m/l/num: [Bt, 1] f32 online-softmax accumulators.
    """
    j = pl.program_id(1)

    @pl.when(j == 0)
    def _():
        m_sc[...] = jnp.full_like(m_sc, -1e30)
        l_sc[...] = jnp.zeros_like(l_sc)
        num_sc[...] = jnp.zeros_like(num_sc)

    bt, sc = ids_ref.shape
    k = tab_ref.shape[0]              # padded_vocab // 128

    ids = ids_ref[...]                # [Bt, Sc] int32
    mask = mask_ref[...]              # [Bt, Sc] int32

    # ---- two-level one-hot "gather" of (value, importance) per token -------
    # token id = hi * 128 + lo
    hi = (ids >> 7)[:, :, None]       # [Bt, Sc, 1]
    lo = (ids & 127)[:, :, None]      # [Bt, Sc, 1]

    # Row select on the MXU: [Bt*Sc, K] @ [K, 256] -> [Bt*Sc, 256]
    oh_hi = (hi == lax.broadcasted_iota(jnp.int32, (bt, sc, k), 2)).astype(jnp.float32)
    rows = jnp.dot(oh_hi.reshape(bt * sc, k), tab_ref[...],
                   preferred_element_type=jnp.float32)
    rows = rows.reshape(bt, sc, 2 * _LANES)   # lanes 0:128 = value, 128:256 = importance

    # Lane select: 128-wide one-hot multiply + lane reduction (XLU).
    oh_lo = (lo == lax.broadcasted_iota(jnp.int32, (bt, sc, _LANES), 2)).astype(jnp.float32)
    val = jnp.sum(rows[:, :, :_LANES] * oh_lo, axis=2)     # [Bt, Sc]
    imp = jnp.sum(rows[:, :, _LANES:] * oh_lo, axis=2)     # [Bt, Sc]
    # NOTE: out-of-range / negative token ids yield val = imp = 0 (one-hot is
    # all-zero), matching the reference's out-of-vocab behavior (zeros).

    # ---- online (flash-style) masked softmax, weighted sum folded ----------
    imp = jnp.where(mask > 0, imp, jnp.float32(-1e30))     # exp underflows to exactly 0
    m_prev = m_sc[...]                                     # [Bt, 1]
    m_new = jnp.maximum(m_prev, jnp.max(imp, axis=1, keepdims=True))
    alpha = jnp.exp(m_prev - m_new)                        # rescale of previous chunks
    p = jnp.exp(imp - m_new)                               # [Bt, Sc]
    l_sc[...] = alpha * l_sc[...] + jnp.sum(p, axis=1, keepdims=True)
    num_sc[...] = alpha * num_sc[...] + jnp.sum(p * val, axis=1, keepdims=True)
    m_sc[...] = m_new

    @pl.when(j == pl.num_programs(1) - 1)
    def _():
        # Approx reciprocal -> EUP slot; deletes the [Bt, S] p = e/denom array.
        out_ref[...] = num_sc[...] * pl.reciprocal(l_sc[...], approx=True)


def _prepare_table_slab(table):
    """[2, V] (value row, importance row) -> [Vpad/128, 256] f32 slab.

    For sublane-row r: lanes [0,128) hold values of token ids [r*128,(r+1)*128),
    lanes [128,256) hold the matching importances.  Vocab is zero-padded to a
    multiple of 1024 so K = Vpad/128 is sublane-aligned (multiple of 8).
    Layout plumbing lives here in the wrapper, not in the kernel.
    """
    v = table.shape[1]
    vpad = _round_up(v, 8 * _LANES)
    t = jnp.pad(table.astype(jnp.float32), ((0, 0), (0, vpad - v)))
    k = vpad // _LANES
    return jnp.concatenate([t[0].reshape(k, _LANES), t[1].reshape(k, _LANES)], axis=1)


def _pick_b_tile(b, sc, k):
    # Size the batch tile so the dominant per-step f32 intermediates
    # (hi one-hot [bt,Sc,K], gathered rows [bt,Sc,256], lo one-hot [bt,Sc,128])
    # stay well inside scoped VMEM (32 MiB scoped / 64 MiB physical on v7x).
    bytes_per_batch_row = sc * (k + 3 * _LANES + 64) * 4
    budget = 8 * 1024 * 1024
    bt = (budget // max(bytes_per_batch_row, 1)) // 8 * 8
    bt = max(8, min(256, bt))                 # multiple of 8 for (8,128) tiling
    return min(bt, _round_up(b, 8))


def _slalom_submodel_call(input_ids, attention_mask, table):
    """SLALOM surrogate forward -> [B, 1] f32 logits (Pallas TPU kernel)."""
    b, s = input_ids.shape
    slab = _prepare_table_slab(table)
    k = slab.shape[0]

    # Sequence chunking: single chunk for short sequences (block = full dim,
    # no 128-alignment needed); 512-token chunks (lane-aligned) otherwise so
    # per-step intermediates stay bounded for arbitrarily long sequences.
    if s <= _S_CHUNK_MAX:
        sc, s_pad = s, s
    else:
        sc = _S_CHUNK_MAX
        s_pad = _round_up(s, sc)

    bt = _pick_b_tile(b, sc, k)
    bp = _round_up(b, bt)

    # Pad seq & batch with token 0 / mask 0: masked positions get importance
    # -1e30 -> exactly zero softmax weight; padded batch rows produce finite
    # garbage that is sliced away below.
    ids = jnp.pad(input_ids.astype(jnp.int32), ((0, bp - b), (0, s_pad - s)))
    msk = jnp.pad(attention_mask.astype(jnp.int32), ((0, bp - b), (0, s_pad - s)))

    tokens = bp * s_pad
    cost = pl.CostEstimate(
        flops=2 * tokens * k * 2 * _LANES + 10 * tokens * _LANES,
        transcendentals=tokens + bp * (s_pad // sc),
        bytes_accessed=2 * tokens * 4 + slab.size * 4 + bp * 4,
    )

    score = pl.pallas_call(
        _slalom_kernel,
        out_shape=jax.ShapeDtypeStruct((bp, 1), jnp.float32),
        grid=(bp // bt, s_pad // sc),
        in_specs=[
            pl.BlockSpec((bt, sc), lambda i, j: (i, j)),
            pl.BlockSpec((bt, sc), lambda i, j: (i, j)),
            pl.BlockSpec((k, 2 * _LANES), lambda i, j: (0, 0)),   # table stays VMEM-resident
        ],
        out_specs=pl.BlockSpec((bt, 1), lambda i, j: (i, 0)),
        scratch_shapes=[
            pltpu.VMEM((bt, 1), jnp.float32),   # running max
            pltpu.VMEM((bt, 1), jnp.float32),   # running denom
            pltpu.VMEM((bt, 1), jnp.float32),   # running numerator
        ],
        compiler_params=pltpu.CompilerParams(
            dimension_semantics=("parallel", "arbitrary")),
        cost_estimate=cost,
    )(ids, msk, slab)
    return score[:b]                                            # [B, 1]


def slalom_model_wrapper_forward(
    input_ids,
    attention_mask=None,
    *,
    table,
    wrap_in_dict=True,
    convert_to_tensor=False,
    extend_output=True,
    target_class=None,
):
    """Mirrors SLALOMModelWrapper.forward (submodel = SLALOM surrogate)."""
    if attention_mask is None:
        attention_mask = jnp.ones_like(input_ids)

    logits = _slalom_submodel_call(input_ids, attention_mask, table)   # [B, 1]
    output = {"logits": logits} if wrap_in_dict else logits

    # convert_to_tensor: torch.from_numpy(...).float() is a host framework
    # conversion; no-op under JAX.
    # TODO(synk): numpy->tensor conversion has no Pallas equivalent.

    def _get():
        return output["logits"] if wrap_in_dict else output

    def _set(x):
        nonlocal output
        if wrap_in_dict:
            output["logits"] = x
        else:
            output = x

    if extend_output:
        res_clm = _get().flatten()                                     # [B]
        _set(jnp.stack([jnp.zeros_like(res_clm), res_clm], axis=1))    # [B, 2]

    if target_class is not None:
        lg = _get()
        n_cls = lg.shape[1]
        non_idx = jnp.array([c for c in range(n_cls) if c != target_class],
                            dtype=jnp.int32)
        target_logit = lg[:, target_class]
        all_class = jax.nn.logsumexp(lg[:, non_idx], axis=1)
        _set(jnp.stack([all_class.ravel(), target_logit.ravel()], axis=1))

    return output


def _reference_forward(input_ids, attention_mask, table):
    """Pure-JAX reference of submodel + extend_output."""
    vtab, stab = table[0], table[1]
    val = vtab[input_ids]
    imp = stab[input_ids]
    maskf = attention_mask.astype(jnp.float32)
    imp = jnp.where(maskf > 0, imp, -1e30)
    m = jnp.max(imp, axis=1, keepdims=True)
    e = jnp.exp(imp - m) * maskf
    p = e / jnp.sum(e, axis=1, keepdims=True)
    score = jnp.sum(p * val, axis=1)                           # [B]
    return jnp.stack([jnp.zeros_like(score), score], axis=1)   # [B, 2]


if __name__ == "__main__":
    B, S, V = 2, 8, 32
    key = jax.random.PRNGKey(0)
    k_ids, k_tab = jax.random.split(key)

    input_ids = jax.random.randint(k_ids, (B, S), 0, V, dtype=jnp.int32)
    # Deterministic synthetic SLALOM parameters: [2, V] (value row, importance row).
    table = jax.random.normal(k_tab, (2, V), dtype=jnp.float32)

    out = slalom_model_wrapper_forward(input_ids, None, table=table)
    logits = jax.block_until_ready(out["logits"])

    ref = _reference_forward(input_ids, jnp.ones_like(input_ids), table)
    assert logits.shape == (B, 2)
    # Tolerance accounts for the approx (EUP) reciprocal in the softmax denominator.
    assert jnp.allclose(logits, ref, atol=2e-3, rtol=2e-3), (logits, ref)

    print("KERNEL_OK")
</pallas_src>

<mosaic_0001>
module attributes {stable_mosaic.version = 11 : i64} {
  func.func @_slalom_kernel(%arg0: i32, %arg1: i32, %arg2: memref<8x8xi32, #tpu.memory_space<vmem>>, %arg3: memref<8x8xi32, #tpu.memory_space<vmem>>, %arg4: memref<8x256xf32, #tpu.memory_space<vmem>>, %arg5: memref<8x1xf32, #tpu.memory_space<vmem>>, %arg6: memref<8x1xf32, #tpu.memory_space<vmem>>, %arg7: memref<8x1xf32, #tpu.memory_space<vmem>>, %arg8: memref<8x1xf32, #tpu.memory_space<vmem>>) attributes {dimension_semantics = [#tpu.dimension_semantics<parallel>, #tpu.dimension_semantics<arbitrary>], iteration_bounds = array<i64: 1, 1>, scalar_prefetch = 0 : i64, scratch_operands = 3 : i64, tpu.core_type = #tpu.core_type<tc>, window_params = [{transform_indices = @transform_0, window_bounds = array<i64: 8, 8>}, {transform_indices = @transform_1, window_bounds = array<i64: 8, 8>}, {pipeline_mode = #tpu.pipeline_mode<synchronous>, transform_indices = @transform_2, window_bounds = array<i64: 8, 256>}, {transform_indices = @transform_3, window_bounds = array<i64: 8, 1>}]} {
    %c0_i32 = arith.constant 0 : i32
    %0 = arith.cmpi eq, %arg1, %c0_i32 : i32
    %1 = arith.extui %0 : i1 to i32
    %c0_i32_0 = arith.constant 0 : i32
    %2 = arith.cmpi ne, %1, %c0_i32_0 : i32
    scf.if %2 {
      %cst_27 = arith.constant -1.000000e+30 : f32
      %61 = vector.broadcast %cst_27 : f32 to vector<8x1xf32>
      %c0_28 = arith.constant 0 : index
      %c0_29 = arith.constant 0 : index
      %62 = vector.load %arg6[%c0_28, %c0_29] : memref<8x1xf32, #tpu.memory_space<vmem>>, vector<8x1xf32>
      tpu.vector_store %arg6[%c0_28, %c0_29], %61 {strides = array<i32>} : memref<8x1xf32, #tpu.memory_space<vmem>>, vector<8x1xf32>,
      %cst_30 = arith.constant 0.000000e+00 : f32
      %63 = vector.broadcast %cst_30 : f32 to vector<8x1xf32>
      %c0_31 = arith.constant 0 : index
      %c0_32 = arith.constant 0 : index
      %64 = vector.load %arg7[%c0_31, %c0_32] : memref<8x1xf32, #tpu.memory_space<vmem>>, vector<8x1xf32>
      tpu.vector_store %arg7[%c0_31, %c0_32], %63 {strides = array<i32>} : memref<8x1xf32, #tpu.memory_space<vmem>>, vector<8x1xf32>,
      %cst_33 = arith.constant 0.000000e+00 : f32
      %65 = vector.broadcast %cst_33 : f32 to vector<8x1xf32>
      %c0_34 = arith.constant 0 : index
      %c0_35 = arith.constant 0 : index
      %66 = vector.load %arg8[%c0_34, %c0_35] : memref<8x1xf32, #tpu.memory_space<vmem>>, vector<8x1xf32>
      tpu.vector_store %arg8[%c0_34, %c0_35], %65 {strides = array<i32>} : memref<8x1xf32, #tpu.memory_space<vmem>>, vector<8x1xf32>,
    } else {
    }
    %c0 = arith.constant 0 : index
    %c0_1 = arith.constant 0 : index
    %3 = vector.load %arg2[%c0, %c0_1] : memref<8x8xi32, #tpu.memory_space<vmem>>, vector<8x8xi32>
    %c0_2 = arith.constant 0 : index
    %c0_3 = arith.constant 0 : index
    %4 = vector.load %arg3[%c0_2, %c0_3] : memref<8x8xi32, #tpu.memory_space<vmem>>, vector<8x8xi32>
    %c7_i32 = arith.constant 7 : i32
    %5 = vector.broadcast %c7_i32 : i32 to vector<8x8xi32>
    %6 = arith.shrsi %3, %5 : vector<8x8xi32>
    %7 = vector.shape_cast %6 : vector<8x8xi32> to vector<8x8x1xi32>
    %c127_i32 = arith.constant 127 : i32
    %8 = vector.broadcast %c127_i32 : i32 to vector<8x8xi32>
    %9 = arith.andi %3, %8 : vector<8x8xi32>
    %10 = vector.shape_cast %9 : vector<8x8xi32> to vector<8x8x1xi32>
    %11 = tpu.iota {dimensions = array<i32: 2>} : vector<8x8x8xi32>
    %12 = vector.broadcast %7 : vector<8x8x1xi32> to vector<8x8x8xi32>
    %13 = arith.cmpi eq, %12, %11 : vector<8x8x8xi32>
    %14 = arith.extui %13 : vector<8x8x8xi1> to vector<8x8x8xi32>
    %15 = arith.sitofp %14 : vector<8x8x8xi32> to vector<8x8x8xf32>
    %16 = vector.shape_cast %15 : vector<8x8x8xf32> to vector<64x8xf32>
    %c0_4 = arith.constant 0 : index
    %c0_5 = arith.constant 0 : index
    %17 = vector.load %arg4[%c0_4, %c0_5] : memref<8x256xf32, #tpu.memory_space<vmem>>, vector<8x256xf32>
    %cst = arith.constant dense<0.000000e+00> : vector<64x256xf32>
    %18 = tpu.matmul %16, %17, %cst {dimension_numbers = #tpu.dot_dimension_numbers<[1], [0], [0], [1], [0, 0, 1, 1], [], []>} : vector<64x8xf32>, vector<8x256xf32>, vector<64x256xf32> -> vector<64x256xf32>
    %19 = vector.shape_cast %18 : vector<64x256xf32> to vector<8x8x256xf32>
    %20 = tpu.iota {dimensions = array<i32: 2>} : vector<8x8x128xi32>
    %21 = vector.broadcast %10 : vector<8x8x1xi32> to vector<8x8x128xi32>
    %22 = arith.cmpi eq, %21, %20 : vector<8x8x128xi32>
    %23 = arith.extui %22 : vector<8x8x128xi1> to vector<8x8x128xi32>
    %24 = arith.sitofp %23 : vector<8x8x128xi32> to vector<8x8x128xf32>
    %25 = vector.extract_strided_slice %19 {offsets = [0, 0, 0], sizes = [8, 8, 128], strides = [1, 1, 1]} : vector<8x8x256xf32> to vector<8x8x128xf32>
    %26 = arith.mulf %25, %24 : vector<8x8x128xf32>
    %cst_6 = arith.constant dense<0.000000e+00> : vector<8x8xf32>
    %27 = vector.multi_reduction <add>, %26, %cst_6 [2] : vector<8x8x128xf32> to vector<8x8xf32>
    %28 = vector.extract_strided_slice %19 {offsets = [0, 0, 128], sizes = [8, 8, 128], strides = [1, 1, 1]} : vector<8x8x256xf32> to vector<8x8x128xf32>
    %29 = arith.mulf %28, %24 : vector<8x8x128xf32>
    %cst_7 = arith.constant dense<0.000000e+00> : vector<8x8xf32>
    %30 = vector.multi_reduction <add>, %29, %cst_7 [2] : vector<8x8x128xf32> to vector<8x8xf32>
    %c0_i32_8 = arith.constant 0 : i32
    %31 = vector.broadcast %c0_i32_8 : i32 to vector<8x8xi32>
    %32 = arith.cmpi sgt, %4, %31 : vector<8x8xi32>
    %cst_9 = arith.constant -1.000000e+30 : f32
    %33 = vector.broadcast %cst_9 : f32 to vector<8x8xf32>
    %34 = arith.select %32, %30, %33 : vector<8x8xi1>, vector<8x8xf32>
    %c0_10 = arith.constant 0 : index
    %c0_11 = arith.constant 0 : index
    %35 = vector.load %arg6[%c0_10, %c0_11] : memref<8x1xf32, #tpu.memory_space<vmem>>, vector<8x1xf32>
    %cst_12 = arith.constant dense<0xFF800000> : vector<8xf32>
    %36 = vector.multi_reduction <maximumf>, %34, %cst_12 [1] : vector<8x8xf32> to vector<8xf32>
    %37 = vector.shape_cast %36 : vector<8xf32> to vector<8x1xf32>
    %38 = arith.maximumf %35, %37 : vector<8x1xf32>
    %39 = arith.subf %35, %38 : vector<8x1xf32>
    %40 = math.exp %39 : vector<8x1xf32>
    %41 = vector.broadcast %38 : vector<8x1xf32> to vector<8x8xf32>
    %42 = arith.subf %34, %41 : vector<8x8xf32>
    %43 = math.exp %42 : vector<8x8xf32>
    %c0_13 = arith.constant 0 : index
    %c0_14 = arith.constant 0 : index
    %44 = vector.load %arg7[%c0_13, %c0_14] : memref<8x1xf32, #tpu.memory_space<vmem>>, vector<8x1xf32>
    %45 = arith.mulf %40, %44 : vector<8x1xf32>
    %cst_15 = arith.constant dense<0.000000e+00> : vector<8xf32>
    %46 = vector.multi_reduction <add>, %43, %cst_15 [1] : vector<8x8xf32> to vector<8xf32>
    %47 = vector.shape_cast %46 : vector<8xf32> to vector<8x1xf32>
    %48 = arith.addf %45, %47 : vector<8x1xf32>
    %c0_16 = arith.constant 0 : index
    %c0_17 = arith.constant 0 : index
    %49 = vector.load %arg7[%c0_16, %c0_17] : memref<8x1xf32, #tpu.memory_space<vmem>>, vector<8x1xf32>
    tpu.vector_store %arg7[%c0_16, %c0_17], %48 {strides = array<i32>} : memref<8x1xf32, #tpu.memory_space<vmem>>, vector<8x1xf32>,
    %c0_18 = arith.constant 0 : index
    %c0_19 = arith.constant 0 : index
    %50 = vector.load %arg8[%c0_18, %c0_19] : memref<8x1xf32, #tpu.memory_space<vmem>>, vector<8x1xf32>
    %51 = arith.mulf %40, %50 : vector<8x1xf32>
    %52 = arith.mulf %43, %27 : vector<8x8xf32>
    %cst_20 = arith.constant dense<0.000000e+00> : vector<8xf32>
    %53 = vector.multi_reduction <add>, %52, %cst_20 [1] : vector<8x8xf32> to vector<8xf32>
    %54 = vector.shape_cast %53 : vector<8xf32> to vector<8x1xf32>
    %55 = arith.addf %51, %54 : vector<8x1xf32>
    %c0_21 = arith.constant 0 : index
    %c0_22 = arith.constant 0 : index
    %56 = vector.load %arg8[%c0_21, %c0_22] : memref<8x1xf32, #tpu.memory_space<vmem>>, vector<8x1xf32>
    tpu.vector_store %arg8[%c0_21, %c0_22], %55 {strides = array<i32>} : memref<8x1xf32, #tpu.memory_space<vmem>>, vector<8x1xf32>,
    %c0_23 = arith.constant 0 : index
    %c0_24 = arith.constant 0 : index
    %57 = vector.load %arg6[%c0_23, %c0_24] : memref<8x1xf32, #tpu.memory_space<vmem>>, vector<8x1xf32>
    tpu.vector_store %arg6[%c0_23, %c0_24], %38 {strides = array<i32>} : memref<8x1xf32, #tpu.memory_space<vmem>>, vector<8x1xf32>,
    %c0_i32_25 = arith.constant 0 : i32
    %58 = arith.cmpi eq, %arg1, %c0_i32_25 : i32
    %59 = arith.extui %58 : i1 to i32
    %c0_i32_26 = arith.constant 0 : i32
    %60 = arith.cmpi ne, %59, %c0_i32_26 : i32
    scf.if %60 {
      %c0_27 = arith.constant 0 : index
      %c0_28 = arith.constant 0 : index
      %61 = vector.load %arg8[%c0_27, %c0_28] : memref<8x1xf32, #tpu.memory_space<vmem>>, vector<8x1xf32>
      %c0_29 = arith.constant 0 : index
      %c0_30 = arith.constant 0 : index
      %62 = vector.load %arg7[%c0_29, %c0_30] : memref<8x1xf32, #tpu.memory_space<vmem>>, vector<8x1xf32>
      %63 = tpu.reciprocal %62 {approx = true} : vector<8x1xf32> -> vector<8x1xf32>
      %64 = arith.mulf %61, %63 : vector<8x1xf32>
      %c0_31 = arith.constant 0 : index
      %c0_32 = arith.constant 0 : index
      %65 = vector.load %arg5[%c0_31, %c0_32] : memref<8x1xf32, #tpu.memory_space<vmem>>, vector<8x1xf32>
      tpu.vector_store %arg5[%c0_31, %c0_32], %64 {strides = array<i32>} : memref<8x1xf32, #tpu.memory_space<vmem>>, vector<8x1xf32>,
    } else {
    }
    return
  }
  func.func @transform_0(%arg0: i32, %arg1: i32) -> (i32, i32) {
    %c0_i32 = arith.constant 0 : i32
    return %arg0, %arg1 : i32, i32
  }
  func.func @transform_1(%arg0: i32, %arg1: i32) -> (i32, i32) {
    %c0_i32 = arith.constant 0 : i32
    return %arg0, %arg1 : i32, i32
  }
  func.func @transform_2(%arg0: i32, %arg1: i32) -> (i32, i32) {
    %c0_i32 = arith.constant 0 : i32
    %c0_i32_0 = arith.constant 0 : i32
    %c0_i32_1 = arith.constant 0 : i32
    return %c0_i32, %c0_i32_0 : i32, i32
  }
  func.func @transform_3(%arg0: i32, %arg1: i32) -> (i32, i32) {
    %c0_i32 = arith.constant 0 : i32
    %c0_i32_0 = arith.constant 0 : i32
    return %arg0, %c0_i32 : i32, i32
  }
}

</mosaic_0001>

<bundles_post_ra>
// kernel: tpu_custom_call.1
= control target key start
LH: loop header
LB: loop body
LE: loop exit
PB: predicated region body
PF: predicated region fallthrough
CT: control target
= control target key end

     0   :  { %8 = vsyncpa [#allocation6], 0  ;;  %s858_s0 = inlined_call_operand.hbm [shape: s32[8,8], index: 0, kind: input, shape index: {}]   ;;  %s859_s1 = inlined_call_operand.hbm [shape: s32[8,8], index: 1, kind: input, shape index: {}]   ;;  %s860_s2 = inlined_call_operand.hbm [shape: f32[8,256], index: 2, kind: input, shape index: {}]   ;;  %s861_s3 = inlined_call_operand.vmem [shape: f32[8,1], index: 3, kind: output, shape index: {}]  }
   0x1   :  { %9 = vsyncpa [#allocation8], 0  ;;  %s672_s12 = smov [#allocation7]   ;;  %s673_s14 = smov [#allocation5]  }
   0x2   :  { %s26_s13 = sshll.u32 %s672_s12, 4  ;;  %s16_s15 = sshll.u32 %s673_s14, 4  ;;  %s27_s13 = int_to_ptr.vmem [resolvable:$true] %s26_s13  ;;  %s17_s15 = int_to_ptr.vmem [resolvable:$true] %s16_s15 }
   0x3   :  { %s602_s18 = scalar_lea.hbm %s859_s1, 128 }
   0x4   :  { %p603_p0 = scmp.ne.s32.totalorder %s859_s1, %s602_s18  ;;  %p606_p1 = scmp.lt.u32.totalorder %s602_s18, %s859_s1 }
   0x6   :  { %p608_p2 = pnand %p606_p1, %p603_p0 }
   0x8   :  { %611 = shalt.err (!%p608_p2)
}
   0x9   :  { %s612_s23 = scalar_lea.vmem %s27_s13, 128  ;;  %p617_p4 = scmp.lt.s32.totalorder %s27_s13, %s27_s13 }
   0xa   :  { %p613_p3 = scmp.ne.s32.totalorder %s27_s13, %s612_s23  ;;  %p618_p5 = scmp.lt.s32.totalorder %s612_s23, %s612_s23 }
   0xc   :  { %p619_p6 = por %p618_p5, %p617_p4 }
   0xe   :  { %p620_p7 = pnand %p619_p6, %p613_p3 }
  0x10   :  { %623 = shalt.err (!%p620_p7)
}
  0x11   :  { %29 = dma.hbm_to_vmem [thread:$0]  %s859_s1, 128, %s27_s13, [#allocation8]  }
  0x12   :  { %s624_s28 = scalar_lea.hbm %s858_s0, 128 }
  0x13   :  { %p625_p8 = scmp.ne.s32.totalorder %s858_s0, %s624_s28  ;;  %p628_p9 = scmp.lt.u32.totalorder %s624_s28, %s858_s0 }
  0x15   :  { %p630_p10 = pnand %p628_p9, %p625_p8 }
  0x17   :  { %633 = shalt.err (!%p630_p10)
}
  0x18   :  { %s634_s6 = scalar_lea.vmem %s17_s15, 128  ;;  %p639_p12 = scmp.lt.s32.totalorder %s17_s15, %s17_s15 }
  0x19   :  { %p635_p11 = scmp.ne.s32.totalorder %s17_s15, %s634_s6  ;;  %p640_p13 = scmp.lt.s32.totalorder %s634_s6, %s634_s6 }
  0x1b   :  { %p641_p0 = por %p640_p13, %p639_p12 }
  0x1d   :  { %p642_p1 = pnand %p641_p0, %p635_p11 }
  0x1f   :  { %645 = shalt.err (!%p642_p1)
}
  0x20   :  { %19 = dma.hbm_to_vmem [thread:$0]  %s858_s0, 128, %s17_s15, [#allocation6]  }
  0x21   :  { %s674_s8 = smov [#allocation9]   ;;  %s646_s12 = scalar_lea.hbm %s860_s2, 256 }
  0x22   :  { %s36_s9 = sshll.u32 %s674_s8, 4  ;;  %p647_p2 = scmp.ne.s32.totalorder %s860_s2, %s646_s12  ;;  %s37_s9 = int_to_ptr.vmem [resolvable:$true] %s36_s9 }
  0x23   :  { %p650_p3 = scmp.lt.u32.totalorder %s646_s12, %s860_s2 }
  0x25   :  { %p652_p4 = pnand %p650_p3, %p647_p2 }
  0x27   :  { %655 = shalt.err (!%p652_p4)
}
  0x28   :  { %s656_s18 = scalar_lea.vmem %s37_s9, 256  ;;  %p661_p6 = scmp.lt.s32.totalorder %s37_s9, %s37_s9 }
  0x29   :  { %p657_p5 = scmp.ne.s32.totalorder %s37_s9, %s656_s18  ;;  %p662_p7 = scmp.lt.s32.totalorder %s656_s18, %s656_s18 }
  0x2b   :  { %p663_p8 = por %p662_p7, %p661_p6 }
  0x2d   :  { %p664_p9 = pnand %p663_p8, %p657_p5 }
  0x2f   :  { %667 = shalt.err (!%p664_p9)
}
  0x30   :  { %39 = dma.hbm_to_vmem [thread:$0]  %s860_s2, 256, %s37_s9, [#allocation8]  }
  0x31   :  { %668 = dma.done.wait [#allocation6], 128  }
  0x32   :  { %669 = vsyncadd [#allocation6], 4294967168 }
  0x33   :  { %670 = dma.done.wait [#allocation8], 384  }
  0x34   :  { %671 = vsyncadd [#allocation8], 4294966912  ;;  %v60_v0 = vlaneseq  ;;  %v675_v1 = vmov 0.0   ;;  %v57_v5 = vld [vmem:[#allocation5] sm:$0xff]  ;;  %v200_v6 = vld [vmem:[#allocation9 + $0x8] sm:$0xff]  ;;  %vm201_vm0 = vcmask 64512  }
  0x35   :  { %290 = vmatprep.mubr.f32.mxu0 %v675_v1  ;;  %314 = vmatprep.mubr.f32.mxu1 %v675_v1  ;;  %v199_v7 = vld [vmem:[#allocation9] sm:$0xff]  ;;  %v59_v8 = vshra.s32 %v57_v5, 7  ;;  %v116_v23 = vand.u32 127, %v57_v5 }
  0x36   :  { %v736_v2 = vshrl.u32 %v60_v0, 7  ;;  %226 = vmatprep.subr.mxu0 %v200_v6  ;;  %587 = vmatprep.subr.mxu1 %v200_v6  ;;  %v746_v32 = vand.u32 127, %v60_v0 }
  0x37   :  { %227 = vmatpush1.msra.mxu0 %v199_v7  ;;  %588 = vmatpush1.msra.mxu1 %v199_v7 }
  0x38   :  { %v62_v3 = vsub.s32 0, %v736_v2  ;;  %v90_v4 = vsub.s32 4, %v736_v2  ;;  %v69_v9 = vsub.s32 1, %v736_v2  ;;  %v76_v10 = vsub.s32 2, %v736_v2 }
  0x39   :  { %v97_v15 = vsub.s32 5, %v736_v2  ;;  %v83_v16 = vsub.s32 3, %v736_v2  ;;  %v104_v19 = vsub.s32 6, %v736_v2  ;;  %v111_v20 = vsub.s32 7, %v736_v2 }
  0x3a   :  { %v63_v11 = vrot.slane %v59_v8, %v62_v3  ;;  %v91_v12 = vrot.slane %v59_v8, %v90_v4  ;;  %v70_v13 = vrot.slane %v59_v8, %v69_v9  ;;  %v77_v14 = vrot.slane %v59_v8, %v76_v10 }
  0x3b   :  { %v98_v17 = vrot.slane %v59_v8, %v97_v15  ;;  %v84_v18 = vrot.slane %v59_v8, %v83_v16  ;;  %v105_v21 = vrot.slane %v59_v8, %v104_v19  ;;  %v112_v22 = vrot.slane %v59_v8, %v111_v20 }
  0x3c   :  { %65 = vbcast.lane.b32.xlu0 %v63_v11, 256  ;;  %93 = vbcast.lane.b32.xlu1 %v91_v12, 256  ;;  %v120_v24 = vrot.slane %v116_v23, %v62_v3  ;;  %v127_v25 = vrot.slane %v116_v23, %v69_v9  ;;  %v134_v26 = vrot.slane %v116_v23, %v76_v10 }
  0x3d   :  { %v141_v27 = vrot.slane %v116_v23, %v83_v16  ;;  %v148_v28 = vrot.slane %v116_v23, %v90_v4  ;;  %v155_v29 = vrot.slane %v116_v23, %v97_v15  ;;  %v162_v30 = vrot.slane %v116_v23, %v104_v19 }
  0x3e   :  { %v169_v31 = vrot.slane %v116_v23, %v111_v20 }
  0x40   :  { %72 = vbcast.lane.b32.xlu0 %v70_v13, 256  ;;  %79 = vbcast.lane.b32.xlu1 %v77_v14, 256 }
  0x44   :  { %100 = vbcast.lane.b32.xlu0 %v98_v17, 256  ;;  %86 = vbcast.lane.b32.xlu1 %v84_v18, 256 }
  0x48   :  { %107 = vbcast.lane.b32.xlu0 %v105_v21, 256  ;;  %114 = vbcast.lane.b32.xlu1 %v112_v22, 256 }
  0x4c   :  { %122 = vbcast.lane.b32.xlu0 %v120_v24, 256  ;;  %129 = vbcast.lane.b32.xlu1 %v127_v25, 256 }
  0x50   :  { %136 = vbcast.lane.b32.xlu0 %v134_v26, 256  ;;  %143 = vbcast.lane.b32.xlu1 %v141_v27, 256 }
  0x54   :  { %150 = vbcast.lane.b32.xlu0 %v148_v28, 256  ;;  %157 = vbcast.lane.b32.xlu1 %v155_v29, 256 }
  0x58   :  { %164 = vbcast.lane.b32.xlu0 %v162_v30, 256  ;;  %171 = vbcast.lane.b32.xlu1 %v169_v31, 256 }
  0xae   :  { %v66_v33 = vpop.permute.xlu0 %65  ;;  %v94_v34 = vpop.permute.xlu1 %93 }
  0xaf   :  { %vm175_vm1 = vcmp.eq.s32.totalorder %v66_v33, %v746_v32  ;;  %vm179_vm2 = vcmp.eq.s32.totalorder %v94_v34, %v746_v32 }
  0xb0   :  { %v563_v35 = vsel %vm175_vm1, 1.0, %v675_v1  ;;  %v567_v36 = vsel %vm179_vm2, 1.0, %v675_v1  ;;  %vm53_vm2 = vcmask 7168  }
  0xb1   :  { %571 = vmatmul.mubr.msk.f32.vlgmr.msra.gmra.mrb[0].mxu0 %vm201_vm0, %v563_v35  ;;  %575 = vmatmul.mubr.msk.f32.vlgmr.msra.gmra.mrb[0].mxu1 %vm201_vm0, %v567_v36  ;;  %v676_v36 = vmov -1e+30   ;;  %55 = vst.msk [vmem:[#allocation3] sm:$0xff] %vm53_vm2, %v675_v1  ;;  %56 = vst.msk [vmem:[#allocation4] sm:$0xff] %vm53_vm2, %v675_v1 }
  0xb2   :  { %v73_v37 = vpop.permute.xlu0 %72  ;;  %296 = vmatprep.mubr.f32.mxu0 %v675_v1  ;;  %v80_v38 = vpop.permute.xlu1 %79  ;;  %320 = vmatprep.mubr.f32.mxu1 %v675_v1  ;;  %54 = vst.msk [vmem:[#allocation2] sm:$0xff] %vm53_vm2, %v676_v36 }
  0xb3   :  { %vm176_vm3 = vcmp.eq.s32.totalorder %v73_v37, %v746_v32  ;;  %vm177_vm4 = vcmp.eq.s32.totalorder %v80_v38, %v746_v32 }
  0xb4   :  { %v564_v39 = vsel %vm176_vm3, 1.0, %v675_v1  ;;  %v565_v40 = vsel %vm177_vm4, 1.0, %v675_v1  ;;  %vm452_vm3 = vcmask 1041409   ;;  %vm454_vm4 = vcmask 1042434  }
  0xb5   :  { %572 = vmatmul.mubr.msk.f32.gmra.mrb[2].mxu0 %vm201_vm0, %v564_v39 }
  0xb6   :  { %v101_v41 = vpop.permute.xlu0 %100  ;;  %302 = vmatprep.mubr.f32.mxu0 %v675_v1  ;;  %v87_v42 = vpop.permute.xlu1 %86 }
  0xb7   :  { %vm180_vm5 = vcmp.eq.s32.totalorder %v101_v41, %v746_v32  ;;  %vm178_vm6 = vcmp.eq.s32.totalorder %v87_v42, %v746_v32 }
  0xb8   :  { %v568_v43 = vsel %vm180_vm5, 1.0, %v675_v1  ;;  %v566_v44 = vsel %vm178_vm6, 1.0, %v675_v1  ;;  %vm456_vm5 = vcmask 1043459   ;;  %vm458_vm6 = vcmask 1044484  }
  0xb9   :  { %573 = vmatmul.mubr.msk.f32.gmra.mrb[4].mxu0 %vm201_vm0, %v565_v40  ;;  %576 = vmatmul.mubr.msk.f32.gmra.mrb[2].mxu1 %vm201_vm0, %v568_v43  ;;  %v811_v40 = vsub.s32 %v746_v32, %v736_v2 }
  0xba   :  { %308 = vmatprep.mubr.f32.mxu0 %v675_v1  ;;  %v108_v45 = vpop.permute.xlu0 %107  ;;  %326 = vmatprep.mubr.f32.mxu1 %v675_v1  ;;  %v115_v46 = vpop.permute.xlu1 %114 }
  0xbb   :  { %vm181_vm7 = vcmp.eq.s32.totalorder %v108_v45, %v746_v32  ;;  %vm182_vm8 = vcmp.eq.s32.totalorder %v115_v46, %v746_v32 }
  0xbc   :  { %v569_v47 = vsel %vm181_vm7, 1.0, %v675_v1  ;;  %v570_v48 = vsel %vm182_vm8, 1.0, %v675_v1  ;;  %vm460_vm7 = vcmask 1045509   ;;  %vm462_vm8 = vcmask 1046534  }
  0xbd   :  { %574 = vmatmul.mubr.msk.f32.gmra.mrb[6].mxu0 %vm201_vm0, %v566_v44  ;;  %577 = vmatmul.mubr.msk.f32.gmra.mrb[4].mxu1 %vm201_vm0, %v569_v47 }
  0xbe   :  { %332 = vmatprep.mubr.f32.mxu1 %v675_v1  ;;  %v123_v49 = vpop.permute.xlu0 %122  ;;  %v130_v51 = vpop.permute.xlu1 %129 }
  0xbf   :  { %vm339_vm9 = vcmp.eq.s32.totalorder %v123_v49, %v746_v32  ;;  %vm340_vm11 = vcmp.eq.s32.totalorder %v130_v51, %v746_v32  ;;  %v58_v49 = vld [vmem:[#allocation7] sm:$0xff] }
  0xc0   :  { %v579_v54 = vsel %vm339_vm9, 1.0, %v675_v1  ;;  %v580_v3 = vsel %vm340_vm11, 1.0, %v675_v1  ;;  %vm464_vm9 = vcmask 1047559  }
  0xc1   :  { %578 = vmatmul.mubr.msk.f32.gmra.mrb[6].mxu1 %vm201_vm0, %v570_v48 }
  0xc2   :  { %v137_v50 = vpop.permute.xlu0 %136  ;;  %v144_v53 = vpop.permute.xlu1 %143 }
  0xc3   :  { %vm341_vm12 = vcmp.eq.s32.totalorder %v137_v50, %v746_v32  ;;  %vm342_vm15 = vcmp.eq.s32.totalorder %v144_v53, %v746_v32 }
  0xc4   :  { %v581_v9 = vsel %vm341_vm12, 1.0, %v675_v1  ;;  %v582_v22 = vsel %vm342_vm15, 1.0, %v675_v1 }
  0xc6   :  { %v151_v52 = vpop.permute.xlu0 %150  ;;  %v158_v56 = vpop.permute.xlu1 %157 }
  0xc7   :  { %vm343_vm10 = vcmp.eq.s32.totalorder %v151_v52, %v746_v32  ;;  %vm344_vm13 = vcmp.eq.s32.totalorder %v158_v56, %v746_v32 }
  0xc8   :  { %v583_v55 = vsel %vm343_vm10, 1.0, %v675_v1  ;;  %v584_v8 = vsel %vm344_vm13, 1.0, %v675_v1  ;;  %vm411_vm10 = vcmp.gt.s32.totalorder %v58_v49, 0 }
  0xca   :  { %v165_v4 = vpop.permute.xlu0 %164  ;;  %v172_v10 = vpop.permute.xlu1 %171 }
  0xcb   :  { %vm345_vm14 = vcmp.eq.s32.totalorder %v165_v4, %v746_v32  ;;  %vm346_vm1 = vcmp.eq.s32.totalorder %v172_v10, %v746_v32 }
  0xcc   :  { %v585_v19 = vsel %vm345_vm14, 1.0, %v675_v1  ;;  %v586_v29 = vsel %vm346_vm1, 1.0, %v675_v1 }
 0x184   :  { %v292_v57 = vpop.f32.mrb[0].mxu0  ;;  %v316_v58 = vpop.f32.mrb[0].mxu1 }
 0x185   :  { %v783_v59 = vmul.f32 %v579_v54, %v292_v57  ;;  %v294_v60 = vpop.f32.mrb[1].mxu0  ;;  %v785_v61 = vmul.f32 %v583_v55, %v316_v58  ;;  %v318_v62 = vpop.f32.mrb[1].mxu1 }
 0x186   :  { %v387_v63 = vmul.f32 %v579_v54, %v294_v60  ;;  %v391_v17 = vmul.f32 %v583_v55, %v318_v62 }
 0x188   :  { %v298_v0 = vpop.f32.mrb[2].mxu0  ;;  %395 = vadd.xlane.f32.xlu0 %v387_v63  ;;  %v677_v63 = vmov 0  }
 0x189   :  { %v790_v5 = vmul.f32 %v580_v3, %v298_v0  ;;  %v300_v6 = vpop.f32.mrb[3].mxu0  ;;  %595 = vset.pattern.permute.xlu0 %v677_v63  ;;  %v468_v0 = vld [vmem:[#allocation2] sm:$0xff] }
 0x18a   :  { %v388_v7 = vmul.f32 %v580_v3, %v300_v6 }
 0x18c   :  { %397 = vadd.xlane.f32.xlu1 %v388_v7  ;;  %v322_v11 = vpop.f32.mrb[2].mxu1  ;;  %v304_v12 = vpop.f32.mrb[4].mxu0 }
 0x18d   :  { %v796_v13 = vmul.f32 %v584_v8, %v322_v11  ;;  %v324_v14 = vpop.f32.mrb[3].mxu1  ;;  %v798_v15 = vmul.f32 %v581_v9, %v304_v12  ;;  %v306_v16 = vpop.f32.mrb[5].mxu0 }
 0x18e   :  { %v392_v18 = vmul.f32 %v584_v8, %v324_v14  ;;  %v389_v20 = vmul.f32 %v581_v9, %v306_v16 }
 0x190   :  { %v310_v21 = vpop.f32.mrb[6].mxu0  ;;  %405 = vadd.xlane.f32.xlu0 %v392_v18  ;;  %403 = vadd.xlane.f32.xlu1 %v391_v17  ;;  %v328_v23 = vpop.f32.mrb[4].mxu1 }
 0x191   :  { %v366_v24 = vmul.f32 %v582_v22, %v310_v21  ;;  %v312_v25 = vpop.f32.mrb[7].mxu0  ;;  %v369_v26 = vmul.f32 %v585_v19, %v328_v23  ;;  %v330_v27 = vpop.f32.mrb[5].mxu1 }
 0x192   :  { %v393_v28 = vmul.f32 %v585_v19, %v330_v27  ;;  %v390_v34 = vmul.f32 %v582_v22, %v312_v25 }
 0x194   :  { %399 = vadd.xlane.f32.xlu0 %v389_v20  ;;  %v334_v30 = vpop.f32.mrb[6].mxu1  ;;  %407 = vadd.xlane.f32.xlu1 %v393_v28 }
 0x195   :  { %v370_v31 = vmul.f32 %v586_v29, %v334_v30  ;;  %v336_v33 = vpop.f32.mrb[7].mxu1 }
 0x196   :  { %v394_v35 = vmul.f32 %v586_v29, %v336_v33 }
 0x198   :  { %401 = vadd.xlane.f32.xlu0 %v390_v34 }
 0x19c   :  { %409 = vadd.xlane.f32.xlu0 %v394_v35 }
 0x215   :  { %v396_v37 = vpop.xlane.xlu0 %395 }
 0x216   :  { %v423_v45 = vrot.slane %v396_v37, %v811_v40  ;;  %v484_v37 = vld [vmem:[#allocation3] sm:$0xff] }
 0x219   :  { %v398_v38 = vpop.xlane.xlu1 %397 }
 0x21a   :  { %v427_v42 = vrot.slane %v398_v38, %v811_v40 }
 0x21c   :  { %v453_v1 = vsel %vm452_vm3, %v427_v42, %v423_v45 }
 0x21d   :  { %v406_v39 = vpop.xlane.xlu0 %405  ;;  %v404_v43 = vpop.xlane.xlu1 %403 }
 0x21e   :  { %v439_v2 = vrot.slane %v404_v43, %v811_v40  ;;  %v443_v50 = vrot.slane %v406_v39, %v811_v40 }
 0x221   :  { %v400_v41 = vpop.xlane.xlu0 %399  ;;  %v408_v47 = vpop.xlane.xlu1 %407 }
 0x222   :  { %v431_v44 = vrot.slane %v400_v41, %v811_v40  ;;  %v447_v52 = vrot.slane %v408_v47, %v811_v40 }
 0x224   :  { %v455_v32 = vsel %vm454_vm4, %v431_v44, %v453_v1 }
 0x225   :  { %v402_v46 = vpop.xlane.xlu0 %401 }
 0x226   :  { %v435_v48 = vrot.slane %v402_v46, %v811_v40 }
 0x228   :  { %v457_v51 = vsel %vm456_vm5, %v435_v48, %v455_v32 }
 0x229   :  { %v459_v53 = vsel %vm458_vm6, %v439_v2, %v457_v51  ;;  %v410_v54 = vpop.xlane.xlu0 %409 }
 0x22a   :  { %v451_v55 = vrot.slane %v410_v54, %v811_v40  ;;  %v461_v56 = vsel %vm460_vm7, %v443_v50, %v459_v53 }
 0x22b   :  { %v463_v57 = vsel %vm462_vm8, %v447_v52, %v461_v56 }
 0x22c   :  { %v465_v58 = vsel %vm464_vm9, %v451_v55, %v463_v57 }
 0x22d   :  { %v467_v60 = vsel %vm411_vm10, %v465_v58, -1e+30 }
 0x22e   :  { %v469_v62 = vsel %vm201_vm0, %v467_v60, -inf }
 0x22f   :  { %470 = vmax.xlane.f32.xlu1 %v469_v62 }
 0x233   :  { %371 = vadd.xlane.f32.xlu1 %v783_v59 }
 0x237   :  { %373 = vadd.xlane.f32.xlu1 %v790_v5 }
 0x23b   :  { %375 = vadd.xlane.f32.xlu1 %v798_v15 }
 0x23f   :  { %377 = vadd.xlane.f32.xlu1 %v366_v24 }
 0x243   :  { %379 = vadd.xlane.f32.xlu1 %v785_v61 }
 0x247   :  { %381 = vadd.xlane.f32.xlu1 %v796_v13 }
 0x24b   :  { %383 = vadd.xlane.f32.xlu1 %v369_v26 }
 0x24f   :  { %385 = vadd.xlane.f32.xlu1 %v370_v31 }
 0x2bc   :  { %v471_v3 = vpop.xlane.xlu1 %470 }
 0x2bd   :  { %v472_v4 = vmax.f32 %v468_v0, %v471_v3 }
 0x2bf   :  { %v473_v6 = vsub.f32 %v468_v0, %v472_v4  ;;  %548 = vst.msk [vmem:[#allocation2] sm:$0xff] %vm53_vm2, %v472_v4  ;;  %478 = vperm.xlu0 %595, %v472_v4  }
 0x2c0   :  { %v372_v59 = vpop.xlane.xlu1 %371 }
 0x2c1   :  { %v505_v16 = vrot.slane %v372_v59, %v811_v40  ;;  %v474_v35 = vmul.f32 1.442695, %v473_v6 }
 0x2c4   :  { %v374_v5 = vpop.xlane.xlu1 %373 }
 0x2c5   :  { %v509_v13 = vrot.slane %v374_v5, %v811_v40 }
 0x2c7   :  { %v534_v20 = vsel %vm452_vm3, %v509_v13, %v505_v16 }
 0x2c8   :  { %v376_v7 = vpop.xlane.xlu1 %375 }
 0x2c9   :  { %v513_v15 = vrot.slane %v376_v7, %v811_v40 }
 0x2cb   :  { %v535_v22 = vsel %vm454_vm4, %v513_v15, %v534_v20 }
 0x2cc   :  { %v378_v8 = vpop.xlane.xlu1 %377 }
 0x2cd   :  { %v517_v17 = vrot.slane %v378_v8, %v811_v40 }
 0x2cf   :  { %v536_v24 = vsel %vm456_vm5, %v517_v17, %v535_v22 }
 0x2d0   :  { %v380_v9 = vpop.xlane.xlu1 %379 }
 0x2d1   :  { %v521_v18 = vrot.slane %v380_v9, %v811_v40 }
 0x2d3   :  { %v537_v26 = vsel %vm458_vm6, %v521_v18, %v536_v24 }
 0x2d4   :  { %v382_v10 = vpop.xlane.xlu1 %381 }
 0x2d5   :  { %v525_v21 = vrot.slane %v382_v10, %v811_v40 }
 0x2d7   :  { %v538_v27 = vsel %vm460_vm7, %v525_v21, %v537_v26 }
 0x2d8   :  { %v384_v61 = vpop.xlane.xlu1 %383 }
 0x2d9   :  { %v529_v23 = vrot.slane %v384_v61, %v811_v40 }
 0x2db   :  { %v539_v28 = vsel %vm462_vm8, %v529_v23, %v538_v27 }
 0x2dc   :  { %v386_v19 = vpop.xlane.xlu1 %385 }
 0x2dd   :  { %v533_v25 = vrot.slane %v386_v19, %v811_v40  ;;  %v492_v40 = vld [vmem:[#allocation4] sm:$0xff] }
 0x2df   :  { %v540_v30 = vsel %vm464_vm9, %v533_v25, %v539_v28 }
 0x33e   :  { %v479_v11 = vpop.permute.xlu0 %478 }
 0x33f   :  { %v481_v12 = vsub.f32 %v467_v60, %v479_v11 }
 0x341   :  { %v482_v14 = vmul.f32 1.442695, %v481_v12 }
 0x343   :  { %596 = vpow2.f32 %v482_v14 }
 0x344   :  { %598 = vpow2.f32 %v474_v35 }
 0x34d   :  { %v597_v29 = vpop.eup %596 }
 0x34e   :  { %v486_v31 = vsel %vm201_vm0, %v597_v29, 0.0  ;;  %v542_v33 = vmul.f32 %v597_v29, %v540_v30  ;;  %v599_v36 = vpop.eup %598 }
 0x34f   :  { %487 = vadd.xlane.f32.xlu1 %v486_v31  ;;  %v485_v38 = vmul.f32 %v599_v36, %v484_v37  ;;  %v493_v42 = vmul.f32 %v599_v36, %v492_v40 }
 0x350   :  { %v543_v34 = vsel %vm201_vm0, %v542_v33, 0.0 }
 0x353   :  { %544 = vadd.xlane.f32.xlu1 %v543_v34 }
 0x3dc   :  { %v488_v39 = vpop.xlane.xlu1 %487 }
 0x3dd   :  { %v489_v41 = vadd.f32 %v488_v39, %v485_v38 }
 0x3df   :  { %491 = vst.msk [vmem:[#allocation3] sm:$0xff] %vm53_vm2, %v489_v41 }
 0x3e0   :  { %v545_v43 = vpop.xlane.xlu1 %544 }
 0x3e1   :  { %v546_v44 = vadd.f32 %v545_v43, %v493_v42 }
 0x3e3   :  { %547 = vst.msk [vmem:[#allocation4] sm:$0xff] %vm53_vm2, %v546_v44 }
 0x3e6   :  { %v553_v45 = vld [vmem:[#allocation3] sm:$0xff] }
 0x3e7   :  { %600 = vrcp.f32 %v553_v45 }
 0x3ea   :  { %v552_v1 = vld [vmem:[#allocation4] sm:$0xff] }
 0x3f1   :  { %v601_v46 = vpop.eup %600 }
 0x3f2   :  { %v555_v47 = vmul.f32 %v601_v46, %v552_v1 }
 0x3f4   :  { %556 = vst.msk [vmem:[%s861_s3] sm:$0xff] %vm53_vm2, %v555_v47 }
 0x3f5   :  { %561 = vsyncpa [#allocation6], 1 }
 0x3f6   :  { %562 = vsyncpa [#allocation8], 1 }

</bundles_post_ra>
